<compile_context>
chip_gen: v7x
topology: tpu7x:2x2x1
jax: 0.10.0
libtpu: 0.0.40
codegen_flags: <defaults>
</compile_context>

<pallas_src>
import numpy as np
import jax
import jax.numpy as jnp
from jax.experimental import pallas as pl
from jax.experimental.pallas import tpu as pltpu

VOCAB_SIZE = 50257   # synthetic vocab modulus (GPT-2-sized)
TOKEN_MULT = 7
TOKEN_ADD = 3
SEQ_LEN = 128        # fixed (padded/truncated) sequence length -> full lane width
BATCH_TILE = 256     # sequences per grid step (multiple of 32 for the int8 tile rule)
PAD_BYTE = 0         # padding byte


def _tokenize_kernel(ids_ref, out_ref):
    """out[b, s] = (byte[b, s] * 7 + 3) % 50257, computed directly on the VPU."""
    # int8 block -> widen to int32, recover the unsigned byte value in [0, 256).
    ids = ids_ref[...].astype(jnp.int32) & 0xFF          # (BATCH_TILE, SEQ_LEN)
    # For bytes, ids * 7 + 3 <= 1788 < 50257, so the `% VOCAB_SIZE` of the
    # synthetic vocab is statically a no-op and is elided (avoids integer-rem
    # lowering; result is bit-identical to the table reference).
    out_ref[...] = ids * TOKEN_MULT + TOKEN_ADD           # lane-dense (256, 128) vst


def tokenize_pallas(byte_ids_i8):
    """byte_ids_i8: (B, SEQ_LEN) int8 (raw utf-8 bytes, viewed signed).

    Returns (B, SEQ_LEN) int32 token ids.
    """
    B, S = byte_ids_i8.shape
    assert S == SEQ_LEN and B % BATCH_TILE == 0
    return pl.pallas_call(
        _tokenize_kernel,
        out_shape=jax.ShapeDtypeStruct((B, S), jnp.int32),
        grid=(B // BATCH_TILE,),
        in_specs=[pl.BlockSpec((BATCH_TILE, S), lambda i: (i, 0))],
        out_specs=pl.BlockSpec((BATCH_TILE, S), lambda i: (i, 0)),
        compiler_params=pltpu.CompilerParams(
            # Batch axis is embarrassingly parallel -> v7x megacore splits it
            # whenever the grid length is >= 2.
            dimension_semantics=("parallel",),
        ),
    )(byte_ids_i8)


def make_vocab_table():
    """Reference-only table of the synthetic vocab: byte b -> (b*7+3) % 50257."""
    b = jnp.arange(256, dtype=jnp.int32)
    return (b * TOKEN_MULT + TOKEN_ADD) % VOCAB_SIZE


def texts_to_byte_ids(texts, seq_len=SEQ_LEN):
    """list[str] -> one (B, seq_len) int8 batch (single small H2D transfer)."""
    rows = np.full((len(texts), seq_len), PAD_BYTE, dtype=np.uint8)
    for i, text in enumerate(texts):
        raw = text.encode("utf-8")[:seq_len]
        rows[i, : len(raw)] = np.frombuffer(raw, dtype=np.uint8)
    # View as int8 (bit-identical) so the on-device array is a signed 8-bit type.
    return jnp.asarray(rows.view(np.int8))


class PreProcessingTransformPallas:
    """Mirrors PreProcessingTransform.forward(text) -> 1-D int token-id array.

    Also accepts a list of strings (batched path) for throughput.
    """

    def __init__(self, seq_len=SEQ_LEN):
        self.seq_len = seq_len
        self.vocab_table = make_vocab_table()   # reference only; kernel needs no table
        # TODO(synk): real tokenizers perform subword merges, add BOS/EOS/pad
        # special tokens, and emit variable-length output; the byte-level
        # fixed-length lookup is the Pallas-expressible subset (padding rows
        # tokenize to vocab[0] rather than a dedicated pad id).

    def __call__(self, texts):
        single = isinstance(texts, str)
        if single:
            texts = [texts]
        n = len(texts)
        # Pad the batch up to a multiple of the batch tile.
        pad = (-n) % BATCH_TILE
        texts = list(texts) + [""] * pad
        byte_ids = texts_to_byte_ids(texts, self.seq_len)   # (Bp, S) int8, one transfer
        tokens = tokenize_pallas(byte_ids)                   # (Bp, S) int32
        tokens = tokens[:n]
        return tokens[0] if single else tokens


if __name__ == "__main__":
    # Deterministic example inputs derived from PRNGKey(0).
    key = jax.random.PRNGKey(0)
    salts = jax.random.randint(key, (8,), 0, 10)
    texts = [f"héllo tpu pallas tokenizer {int(s)} " * 3 for s in salts]  # non-ASCII byte too

    transform = PreProcessingTransformPallas()

    # Batched path (8 real sequences, padded internally to one 256x128 tile).
    token_ids = transform(texts)
    token_ids = jax.block_until_ready(token_ids)

    # Cross-check against a plain-JAX table-gather reference of the same vocab.
    batch_bytes = texts_to_byte_ids(texts).astype(jnp.int32) & 0xFF
    ref = transform.vocab_table[batch_bytes]
    assert token_ids.shape == (8, SEQ_LEN)
    assert token_ids.dtype == jnp.int32
    assert bool(jnp.all(token_ids == ref))

    # Single-string path matches the original forward(text) -> 1-D tensor.
    single = jax.block_until_ready(transform(texts[0]))
    assert single.shape == (SEQ_LEN,)
    assert bool(jnp.all(single == ref[0]))

    print("KERNEL_OK")
</pallas_src>

<mosaic_0001>
module attributes {stable_mosaic.version = 11 : i64} {
  func.func @_tokenize_kernel(%arg0: i32, %arg1: memref<256x128xi8, #tpu.memory_space<vmem>>, %arg2: memref<256x128xi32, #tpu.memory_space<vmem>>) attributes {dimension_semantics = [#tpu.dimension_semantics<parallel>], iteration_bounds = array<i64: 1>, scalar_prefetch = 0 : i64, scratch_operands = 0 : i64, tpu.core_type = #tpu.core_type<tc>, window_params = [{transform_indices = @transform_0, window_bounds = array<i64: 256, 128>}, {transform_indices = @transform_1, window_bounds = array<i64: 256, 128>}]} {
    %c0 = arith.constant 0 : index
    %c0_0 = arith.constant 0 : index
    %0 = vector.load %arg1[%c0, %c0_0] : memref<256x128xi8, #tpu.memory_space<vmem>>, vector<256x128xi8>
    %1 = arith.extsi %0 : vector<256x128xi8> to vector<256x128xi32>
    %c255_i32 = arith.constant 255 : i32
    %2 = vector.broadcast %c255_i32 : i32 to vector<256x128xi32>
    %3 = arith.andi %1, %2 : vector<256x128xi32>
    %c7_i32 = arith.constant 7 : i32
    %4 = vector.broadcast %c7_i32 : i32 to vector<256x128xi32>
    %5 = arith.muli %3, %4 : vector<256x128xi32>
    %c3_i32 = arith.constant 3 : i32
    %6 = vector.broadcast %c3_i32 : i32 to vector<256x128xi32>
    %7 = arith.addi %5, %6 : vector<256x128xi32>
    %c0_1 = arith.constant 0 : index
    %c0_2 = arith.constant 0 : index
    %8 = vector.load %arg2[%c0_1, %c0_2] : memref<256x128xi32, #tpu.memory_space<vmem>>, vector<256x128xi32>
    tpu.vector_store %arg2[%c0_1, %c0_2], %7 {strides = array<i32>} : memref<256x128xi32, #tpu.memory_space<vmem>>, vector<256x128xi32>,
    return
  }
  func.func @transform_0(%arg0: i32) -> (i32, i32) {
    %c0_i32 = arith.constant 0 : i32
    %c0_i32_0 = arith.constant 0 : i32
    return %arg0, %c0_i32 : i32, i32
  }
  func.func @transform_1(%arg0: i32) -> (i32, i32) {
    %c0_i32 = arith.constant 0 : i32
    %c0_i32_0 = arith.constant 0 : i32
    return %arg0, %c0_i32 : i32, i32
  }
}

</mosaic_0001>

<bundles_post_ra>
// kernel: tpu_custom_call.1
= control target key start
LH: loop header
LB: loop body
LE: loop exit
PB: predicated region body
PF: predicated region fallthrough
CT: control target
= control target key end

     0   :  { %6 = vsyncpa [#allocation3], 0  ;;  %s304_s0 = inlined_call_operand.hbm [shape: s8[256,128], index: 0, kind: input, shape index: {}]   ;;  %s305_s1 = inlined_call_operand.hbm [shape: s32[256,128], index: 1, kind: output, shape index: {}]  }
   0x1   :  { %7 = vsyncpa [#allocation4], 0  ;;  %s260_s6 = smov [#allocation2]   ;;  %s212_s10 = scalar_lea.hbm %s304_s0, 1024 }
   0x2   :  { %s13_s7 = sshll.u32 %s260_s6, 4  ;;  %p213_p0 = scmp.ne.s32.totalorder %s304_s0, %s212_s10  ;;  %s14_s7 = int_to_ptr.vmem [resolvable:$true] %s13_s7 }
   0x3   :  { %p216_p1 = scmp.lt.u32.totalorder %s212_s10, %s304_s0 }
   0x5   :  { %p218_p2 = pnand %p216_p1, %p213_p0 }
   0x7   :  { %221 = shalt.err (!%p218_p2)
}
   0x8   :  { %s222_s15 = scalar_lea.vmem %s14_s7, 1024  ;;  %p227_p4 = scmp.lt.s32.totalorder %s14_s7, %s14_s7 }
   0x9   :  { %p223_p3 = scmp.ne.s32.totalorder %s14_s7, %s222_s15  ;;  %p228_p5 = scmp.lt.s32.totalorder %s222_s15, %s222_s15 }
   0xb   :  { %p229_p6 = por %p228_p5, %p227_p4 }
   0xd   :  { %p230_p7 = pnand %p229_p6, %p223_p3 }
   0xf   :  { %233 = shalt.err (!%p230_p7)
}
  0x10   :  { %s261_s16 = smov 128   ;;  %s262_s17 = smov 8  }
  0x11   :  { %19 = dma.hbm_to_vmem [thread:$0]  %s304_s0, 1024, %s14_s7, [#allocation3], %s261_s16, %s261_s16, %s262_s17  }
  0x12   :  { %256 = dma.done.wait [#allocation3], 1024  }
  0x13   :  { %257 = vsyncadd [#allocation3], 4294966272  ;;  %v23_v0 = vld [vmem:[#allocation2] sm:$0xff]  ;;  %v24_v1 = vld [vmem:[#allocation2 + $0x8] sm:$0xff]  ;;  %s263_s0 = smov [#allocation5]  }
  0x14   :  { %v31_v2 = vunpack.c.0.s8 %v23_v0  ;;  %v32_v3 = vunpack.c.1.s8 %v23_v0  ;;  %v33_v4 = vunpack.c.2.s8 %v23_v0  ;;  %v34_v5 = vunpack.c.3.s8 %v23_v0  ;;  %v25_v10 = vld [vmem:[#allocation2 + $0x10] sm:$0xff]  ;;  %v26_v35 = vld [vmem:[#allocation2 + $0x18] sm:$0xff]  ;;  %v27_v52 = vld [vmem:[#allocation2 + $0x20] sm:$0xff]  ;;  %s196_s20 = sshll.u32 %s263_s0, 4  ;;  %s197_s20 = int_to_ptr.vmem [resolvable:$true] %s196_s20 }
  0x15   :  { %v35_v6 = vunpack.c.0.s8 %v24_v1  ;;  %v36_v7 = vunpack.c.1.s8 %v24_v1  ;;  %v37_v8 = vunpack.c.2.s8 %v24_v1  ;;  %v38_v9 = vunpack.c.3.s8 %v24_v1  ;;  %s234_s21 = scalar_lea.vmem %s197_s20, 4096  ;;  %p239_p9 = scmp.lt.s32.totalorder %s197_s20, %s197_s20 }
  0x16   :  { %v63_v11 = vand.u32 255, %v31_v2  ;;  %v64_v12 = vand.u32 255, %v32_v3  ;;  %v65_v13 = vand.u32 255, %v33_v4  ;;  %v66_v14 = vand.u32 255, %v34_v5  ;;  %v28_v5 = vld [vmem:[#allocation2 + $0x28] sm:$0xff]  ;;  %p235_p8 = scmp.ne.s32.totalorder %s197_s20, %s234_s21  ;;  %p240_p10 = scmp.lt.s32.totalorder %s234_s21, %s234_s21 }
  0x17   :  { %v67_v15 = vand.u32 255, %v35_v6  ;;  %v68_v16 = vand.u32 255, %v36_v7  ;;  %v69_v17 = vand.u32 255, %v37_v8  ;;  %v70_v18 = vand.u32 255, %v38_v9 }
  0x18   :  { %v95_v19 = vmul.u32 7, %v63_v11  ;;  %v96_v20 = vmul.u32 7, %v64_v12  ;;  %v39_v21 = vunpack.c.0.s8 %v25_v10  ;;  %v40_v22 = vunpack.c.1.s8 %v25_v10  ;;  %p241_p11 = por %p240_p10, %p239_p9 }
  0x19   :  { %v97_v23 = vmul.u32 7, %v65_v13  ;;  %v98_v24 = vmul.u32 7, %v66_v14  ;;  %v41_v25 = vunpack.c.2.s8 %v25_v10  ;;  %v42_v26 = vunpack.c.3.s8 %v25_v10 }
  0x1a   :  { %v127_v27 = vadd.s32 3, %v95_v19  ;;  %v128_v28 = vadd.s32 3, %v96_v20  ;;  %v99_v29 = vmul.u32 7, %v67_v15  ;;  %v100_v30 = vmul.u32 7, %v68_v16  ;;  %p242_p12 = pnand %p241_p11, %p235_p8 }
  0x1b   :  { %v129_v31 = vadd.s32 3, %v97_v23  ;;  %v130_v32 = vadd.s32 3, %v98_v24  ;;  %v101_v33 = vmul.u32 7, %v69_v17  ;;  %v102_v34 = vmul.u32 7, %v70_v18 }
  0x1c   :  { %159 = vst [vmem:[#allocation5] sm:$0xff] %v127_v27  ;;  %160 = vst [vmem:[#allocation5 + $0x8] sm:$0xff] %v128_v28  ;;  %v131_v36 = vadd.s32 3, %v99_v29  ;;  %v132_v37 = vadd.s32 3, %v100_v30  ;;  %v71_v38 = vand.u32 255, %v39_v21  ;;  %v72_v39 = vand.u32 255, %v40_v22 }
  0x1d   :  { %161 = vst [vmem:[#allocation5 + $0x10] sm:$0xff] %v129_v31  ;;  %162 = vst [vmem:[#allocation5 + $0x18] sm:$0xff] %v130_v32  ;;  %v133_v40 = vadd.s32 3, %v101_v33  ;;  %v134_v41 = vadd.s32 3, %v102_v34  ;;  %v73_v42 = vand.u32 255, %v41_v25  ;;  %v74_v43 = vand.u32 255, %v42_v26 }
  0x1e   :  { %163 = vst [vmem:[#allocation5 + $0x20] sm:$0xff] %v131_v36  ;;  %164 = vst [vmem:[#allocation5 + $0x28] sm:$0xff] %v132_v37  ;;  %v103_v44 = vmul.u32 7, %v71_v38  ;;  %v104_v45 = vmul.u32 7, %v72_v39  ;;  %v43_v46 = vunpack.c.0.s8 %v26_v35  ;;  %v44_v47 = vunpack.c.1.s8 %v26_v35  ;;  %v29_v22 = vld [vmem:[#allocation2 + $0x30] sm:$0xff]  ;;  %v30_v39 = vld [vmem:[#allocation2 + $0x38] sm:$0xff] }
  0x1f   :  { %165 = vst [vmem:[#allocation5 + $0x30] sm:$0xff] %v133_v40  ;;  %166 = vst [vmem:[#allocation5 + $0x38] sm:$0xff] %v134_v41  ;;  %v105_v48 = vmul.u32 7, %v73_v42  ;;  %v106_v49 = vmul.u32 7, %v74_v43  ;;  %v45_v50 = vunpack.c.2.s8 %v26_v35  ;;  %v46_v51 = vunpack.c.3.s8 %v26_v35 }
  0x20   :  { %v135_v53 = vadd.s32 3, %v103_v44  ;;  %v136_v54 = vadd.s32 3, %v104_v45  ;;  %v75_v55 = vand.u32 255, %v43_v46  ;;  %v76_v56 = vand.u32 255, %v44_v47 }
  0x21   :  { %v137_v57 = vadd.s32 3, %v105_v48  ;;  %v138_v58 = vadd.s32 3, %v106_v49  ;;  %v77_v59 = vand.u32 255, %v45_v50  ;;  %v78_v60 = vand.u32 255, %v46_v51 }
  0x22   :  { %167 = vst [vmem:[#allocation5 + $0x40] sm:$0xff] %v135_v53  ;;  %168 = vst [vmem:[#allocation5 + $0x48] sm:$0xff] %v136_v54  ;;  %v107_v61 = vmul.u32 7, %v75_v55  ;;  %v108_v62 = vmul.u32 7, %v76_v56  ;;  %v47_v63 = vunpack.c.0.s8 %v27_v52  ;;  %v48_v0 = vunpack.c.1.s8 %v27_v52 }
  0x23   :  { %169 = vst [vmem:[#allocation5 + $0x50] sm:$0xff] %v137_v57  ;;  %170 = vst [vmem:[#allocation5 + $0x58] sm:$0xff] %v138_v58  ;;  %v109_v1 = vmul.u32 7, %v77_v59  ;;  %v110_v2 = vmul.u32 7, %v78_v60  ;;  %v49_v3 = vunpack.c.2.s8 %v27_v52  ;;  %v50_v4 = vunpack.c.3.s8 %v27_v52 }
  0x24   :  { %v139_v6 = vadd.s32 3, %v107_v61  ;;  %v140_v7 = vadd.s32 3, %v108_v62  ;;  %v79_v8 = vand.u32 255, %v47_v63  ;;  %v80_v9 = vand.u32 255, %v48_v0 }
  0x25   :  { %v141_v10 = vadd.s32 3, %v109_v1  ;;  %v142_v11 = vadd.s32 3, %v110_v2  ;;  %v81_v12 = vand.u32 255, %v49_v3  ;;  %v82_v13 = vand.u32 255, %v50_v4 }
  0x26   :  { %171 = vst [vmem:[#allocation5 + $0x60] sm:$0xff] %v139_v6  ;;  %172 = vst [vmem:[#allocation5 + $0x68] sm:$0xff] %v140_v7  ;;  %v111_v14 = vmul.u32 7, %v79_v8  ;;  %v112_v15 = vmul.u32 7, %v80_v9  ;;  %v51_v16 = vunpack.c.0.s8 %v28_v5  ;;  %v52_v17 = vunpack.c.1.s8 %v28_v5 }
  0x27   :  { %173 = vst [vmem:[#allocation5 + $0x70] sm:$0xff] %v141_v10  ;;  %174 = vst [vmem:[#allocation5 + $0x78] sm:$0xff] %v142_v11  ;;  %v113_v18 = vmul.u32 7, %v81_v12  ;;  %v114_v19 = vmul.u32 7, %v82_v13  ;;  %v53_v20 = vunpack.c.2.s8 %v28_v5  ;;  %v54_v21 = vunpack.c.3.s8 %v28_v5 }
  0x28   :  { %v143_v23 = vadd.s32 3, %v111_v14  ;;  %v144_v24 = vadd.s32 3, %v112_v15  ;;  %v83_v25 = vand.u32 255, %v51_v16  ;;  %v84_v26 = vand.u32 255, %v52_v17 }
  0x29   :  { %v145_v27 = vadd.s32 3, %v113_v18  ;;  %v146_v28 = vadd.s32 3, %v114_v19  ;;  %v85_v29 = vand.u32 255, %v53_v20  ;;  %v86_v30 = vand.u32 255, %v54_v21 }
  0x2a   :  { %175 = vst [vmem:[#allocation5 + $0x80] sm:$0xff] %v143_v23  ;;  %176 = vst [vmem:[#allocation5 + $0x88] sm:$0xff] %v144_v24  ;;  %v115_v31 = vmul.u32 7, %v83_v25  ;;  %v116_v32 = vmul.u32 7, %v84_v26  ;;  %v55_v33 = vunpack.c.0.s8 %v29_v22  ;;  %v56_v34 = vunpack.c.1.s8 %v29_v22 }
  0x2b   :  { %177 = vst [vmem:[#allocation5 + $0x90] sm:$0xff] %v145_v27  ;;  %178 = vst [vmem:[#allocation5 + $0x98] sm:$0xff] %v146_v28  ;;  %v117_v35 = vmul.u32 7, %v85_v29  ;;  %v118_v36 = vmul.u32 7, %v86_v30  ;;  %v57_v37 = vunpack.c.2.s8 %v29_v22  ;;  %v58_v38 = vunpack.c.3.s8 %v29_v22 }
  0x2c   :  { %v147_v40 = vadd.s32 3, %v115_v31  ;;  %v148_v41 = vadd.s32 3, %v116_v32  ;;  %v87_v42 = vand.u32 255, %v55_v33  ;;  %v88_v43 = vand.u32 255, %v56_v34 }
  0x2d   :  { %v149_v44 = vadd.s32 3, %v117_v35  ;;  %v150_v45 = vadd.s32 3, %v118_v36  ;;  %v89_v46 = vand.u32 255, %v57_v37  ;;  %v90_v47 = vand.u32 255, %v58_v38 }
  0x2e   :  { %179 = vst [vmem:[#allocation5 + $0xa0] sm:$0xff] %v147_v40  ;;  %180 = vst [vmem:[#allocation5 + $0xa8] sm:$0xff] %v148_v41  ;;  %v119_v48 = vmul.u32 7, %v87_v42  ;;  %v120_v49 = vmul.u32 7, %v88_v43  ;;  %v59_v50 = vunpack.c.0.s8 %v30_v39  ;;  %v60_v51 = vunpack.c.1.s8 %v30_v39 }
  0x2f   :  { %181 = vst [vmem:[#allocation5 + $0xb0] sm:$0xff] %v149_v44  ;;  %182 = vst [vmem:[#allocation5 + $0xb8] sm:$0xff] %v150_v45  ;;  %v121_v52 = vmul.u32 7, %v89_v46  ;;  %v122_v53 = vmul.u32 7, %v90_v47  ;;  %v61_v54 = vunpack.c.2.s8 %v30_v39  ;;  %v62_v55 = vunpack.c.3.s8 %v30_v39 }
  0x30   :  { %v151_v56 = vadd.s32 3, %v119_v48  ;;  %v152_v57 = vadd.s32 3, %v120_v49  ;;  %v91_v58 = vand.u32 255, %v59_v50  ;;  %v92_v59 = vand.u32 255, %v60_v51 }
  0x31   :  { %v153_v60 = vadd.s32 3, %v121_v52  ;;  %v154_v61 = vadd.s32 3, %v122_v53  ;;  %v93_v62 = vand.u32 255, %v61_v54  ;;  %v94_v63 = vand.u32 255, %v62_v55 }
  0x32   :  { %183 = vst [vmem:[#allocation5 + $0xc0] sm:$0xff] %v151_v56  ;;  %184 = vst [vmem:[#allocation5 + $0xc8] sm:$0xff] %v152_v57  ;;  %v123_v0 = vmul.u32 7, %v91_v58  ;;  %v124_v1 = vmul.u32 7, %v92_v59 }
  0x33   :  { %185 = vst [vmem:[#allocation5 + $0xd0] sm:$0xff] %v153_v60  ;;  %186 = vst [vmem:[#allocation5 + $0xd8] sm:$0xff] %v154_v61  ;;  %v125_v2 = vmul.u32 7, %v93_v62  ;;  %v126_v3 = vmul.u32 7, %v94_v63 }
  0x34   :  { %v155_v4 = vadd.s32 3, %v123_v0  ;;  %v156_v5 = vadd.s32 3, %v124_v1 }
  0x35   :  { %v157_v6 = vadd.s32 3, %v125_v2  ;;  %v158_v7 = vadd.s32 3, %v126_v3 }
  0x36   :  { %187 = vst [vmem:[#allocation5 + $0xe0] sm:$0xff] %v155_v4  ;;  %188 = vst [vmem:[#allocation5 + $0xe8] sm:$0xff] %v156_v5 }
  0x37   :  { %189 = vst [vmem:[#allocation5 + $0xf0] sm:$0xff] %v157_v6  ;;  %190 = vst [vmem:[#allocation5 + $0xf8] sm:$0xff] %v158_v7 }
  0x38   :  { %245 = shalt.err (!%p242_p12)
}
  0x39   :  { %s246_s24 = scalar_lea.hbm %s305_s1, 4096 }
  0x3a   :  { %p247_p13 = scmp.ne.s32.totalorder %s305_s1, %s246_s24  ;;  %p250_p0 = scmp.lt.u32.totalorder %s246_s24, %s305_s1 }
  0x3c   :  { %p252_p1 = pnand %p250_p0, %p247_p13 }
  0x3e   :  { %255 = shalt.err (!%p252_p1)
}
  0x3f   :  { %202 = dma.vmem_to_hbm [thread:$0]  %s197_s20, 4096, %s305_s1, [#allocation4], %s261_s16, %s261_s16, %s262_s17  }
  0x40   :  { %258 = dma.done.wait [#allocation4], 4096  }
  0x41   :  { %259 = vsyncadd [#allocation4], 4294963200 }
  0x42   :  { %206 = vsyncpa [#allocation3], 1 }
  0x43   :  { %207 = vsyncpa [#allocation4], 1 }

</bundles_post_ra>
